<compile_context>
chip_gen: v5e
topology: v5e:2x2
jax: 0.10.0
libtpu: 0.0.40
codegen_flags: <defaults>
</compile_context>

<pallas_src>
import functools

import jax
import jax.numpy as jnp
import numpy as np
from jax import lax
from jax.experimental import pallas as pl
from jax.experimental.pallas import tpu as pltpu

HIGHEST = lax.Precision.HIGHEST  # reference (plain JAX) only; NOT used in the kernel


# ----------------------------- Pallas kernel -----------------------------


def _graph_kernel(T, H, C, N, E, K,
                  feat_ref,      # (1, T*H*C, N)   features of one batch elem (rows = (t,h,c))
                  gdiffT_ref,    # (N, N*E)        col (n,e) = onehot(n) - onehot(j)  (j term 0 if -1)
                  grepU_ref,     # (N*E, N)        row (n,e) -> col n   (degree sum)
                  grepUT_ref,    # (N, N*E)        broadcast node value to its (n,e) columns
                  gdUT_ref,      # (N, N*E)        col (n,e) = onehot(wrap(j))  (torch -1 -> N-1)
                  nmU_ref,       # (1, N*E)        1.0 where neighbor valid
                  wm_ref,        # (T*H*C, T*H*C)  kron(I_T, blockdiag_h(M[h]))
                  pool_ref,      # (T*H,  T*H*C)   kron(I_{T*H}, ones(1,C))  channel pooling
                  gfTD_ref,      # (N, N*K)        col (n,k) = onehot(j)  (0 if -1)
                  grepD_ref,     # (N*K, N)
                  grepDT_ref,    # (N, N*K)
                  nmD_ref,       # (1, N*K)
                  wb_ref,        # (T*H*C, T*H*C)  kron(I_T, blockdiag_h(Q1[h]^T Q2[h]))
                  u_ref,         # (1, T*H, N*E)
                  d_ref):        # (1, (T-1)*H, N*K)
    HC = H * C
    F = feat_ref[0]                                                     # (T*HC, N)

    # -------------------- undirected graph --------------------
    # Apply M per head (block-diag matmul), THEN take neighbor differences (linear ops
    # commute), so the gather matmul runs on the smaller (T*HC, N) operand.
    MF = jnp.dot(wm_ref[...], F, preferred_element_type=jnp.float32)    # (T*HC, N)
    MdT = jnp.dot(MF, gdiffT_ref[...],
                  preferred_element_type=jnp.float32)                   # (T*HC, NE) = M (x_i - x_j)
    sU = jnp.dot(pool_ref[...], MdT * MdT,
                 preferred_element_type=jnp.float32)                    # (T*H, NE) = ||M df||^2
    w = jnp.exp(-sU) * nmU_ref[...]                                     # (T*H, NE)

    # Degree reductions / broadcasts as small full-lane matmuls (the MXU is idle; no
    # single-output-lane dots and no per-head loop).
    deg = jnp.dot(w, grepU_ref[...], preferred_element_type=jnp.float32)      # (T*H, N)
    deg_i = jnp.dot(deg, grepUT_ref[...], preferred_element_type=jnp.float32)  # (T*H, NE)
    deg_j = jnp.dot(deg, gdUT_ref[...], preferred_element_type=jnp.float32)    # (T*H, NE)
    dm = deg_i * deg_j
    inv = jnp.where(dm > 0.0, lax.rsqrt(dm), 0.0)                       # guarded rsqrt (EUP)
    u_ref[0] = w * inv

    # -------------------- directed graph --------------------
    Sd = (T - 1) * HC
    Fp = F[:Sd]                                                         # steps 0..T-2
    BF = jnp.dot(wb_ref[...], F, preferred_element_type=jnp.float32)    # (Q1^T Q2) x, all steps
    BFn = BF[HC:]                                                       # steps 1..T-1, (Sd, N)

    fi = jnp.dot(Fp, gfTD_ref[...], preferred_element_type=jnp.float32)     # (Sd, NK) gathered x_i
    bj = jnp.dot(BFn, grepDT_ref[...], preferred_element_type=jnp.float32)  # (Sd, NK) broadcast Bq x_j
    pool = pool_ref[...]
    sD = jnp.dot(pool[:(T - 1) * H, :Sd], fi * bj,
                 preferred_element_type=jnp.float32)                    # ((T-1)*H, NK) = Qi . Qj
    wd = jnp.exp(-sD) * nmD_ref[...]

    indeg = jnp.dot(wd, grepD_ref[...], preferred_element_type=jnp.float32)       # ((T-1)*H, N)
    indeg_rep = jnp.dot(indeg, grepDT_ref[...], preferred_element_type=jnp.float32)  # ((T-1)*H, NK)
    invd = jnp.where(indeg_rep > 0.0, pl.reciprocal(indeg_rep, approx=True), 0.0)
    d_ref[0] = wd * invd


# ------------------------------ JAX wrapper --------------------------------


def _one_hot_cols(idx, num):
    """(num, len(idx)) matrix; column i = onehot(idx[i]); all-zero column for idx == -1."""
    return (idx[None, :] == jnp.arange(num, dtype=jnp.int32)[:, None]).astype(jnp.float32)


def _block_diag(mats):
    """(H, r, c) -> (H*r, H*c) block-diagonal."""
    H, r, c = mats.shape
    out = jnp.zeros((H * r, H * c), mats.dtype)
    for h in range(H):
        out = out.at[h * r:(h + 1) * r, h * c:(h + 1) * c].set(mats[h])
    return out


def init_params(n_heads, n_channels, Q1_init=1.2, Q2_init=0.8, M_init=1.5):
    n_out = (n_channels + 1) // 2
    q_form = jnp.broadcast_to(jnp.eye(n_out, n_channels, dtype=jnp.float32),
                              (n_heads, n_out, n_channels))
    multiQ1 = q_form * Q1_init
    multiQ2 = q_form * Q2_init
    multiM = jnp.broadcast_to(jnp.eye(n_channels, dtype=jnp.float32),
                              (n_heads, n_channels, n_channels)) * M_init
    return multiQ1, multiQ2, multiM


def graph_learning_forward(features, multiQ1, multiQ2, multiM, nearest_nodes):
    """Returns (u_ew, d_ew) matching GraphLearningModule.forward (shared_params=True)."""
    B, T, N, H, C = features.shape
    K = nearest_nodes.shape[1]
    E = K - 1
    NE, NK = N * E, N * K
    HC, THC, TH = H * C, T * H * C, T * H
    nn = nearest_nodes

    # -------- constant gather / projection matrices (built once, outside the kernel) ----
    idx_u = nn[:, 1:].reshape(-1)                                   # (NE,)
    rep_u = jnp.repeat(jnp.arange(N, dtype=jnp.int32), E)           # (NE,)
    grepUT = _one_hot_cols(rep_u, N)                                # (N, NE)
    gdiffT = grepUT - _one_hot_cols(idx_u, N)                       # (N, NE)
    grepU = grepUT.T                                                # (NE, N)
    gdUT = _one_hot_cols(jnp.where(idx_u < 0, idx_u + N, idx_u), N)  # torch -1 -> N-1
    nmU = (idx_u != -1).astype(jnp.float32)[None, :]                # (1, NE)

    idx_d = nn.reshape(-1)                                          # (NK,)
    rep_d = jnp.repeat(jnp.arange(N, dtype=jnp.int32), K)
    gfTD = _one_hot_cols(idx_d, N)                                  # (N, NK)
    grepDT = _one_hot_cols(rep_d, N)                                # (N, NK)
    grepD = grepDT.T                                                # (NK, N)
    nmD = (idx_d != -1).astype(jnp.float32)[None, :]                # (1, NK)

    eyeT = jnp.eye(T, dtype=jnp.float32)
    Wm = jnp.kron(eyeT, _block_diag(multiM))                        # (THC, THC)
    Bq = jnp.einsum('hoc,hod->hcd', multiQ1, multiQ2)               # Q1^T Q2 per head
    Wb = jnp.kron(eyeT, _block_diag(Bq))                            # (THC, THC)
    Pool = jnp.kron(jnp.eye(TH, dtype=jnp.float32),
                    jnp.ones((1, C), jnp.float32))                  # (TH, THC)

    # One shared transposed feature buffer: rows = (t, h, c), lanes = nodes.
    feat_kernel = features.transpose(0, 1, 3, 4, 2).reshape(B, THC, N)

    const2d = lambda shape: pl.BlockSpec(shape, lambda b: (0, 0))
    u_out, d_out = pl.pallas_call(
        functools.partial(_graph_kernel, T, H, C, N, E, K),
        out_shape=[jax.ShapeDtypeStruct((B, TH, NE), jnp.float32),
                   jax.ShapeDtypeStruct((B, (T - 1) * H, NK), jnp.float32)],
        grid=(B,),
        in_specs=[
            pl.BlockSpec((1, THC, N), lambda b: (b, 0, 0)),   # features (per batch elem)
            const2d((N, NE)),                                 # gdiffT
            const2d((NE, N)),                                 # grepU
            const2d((N, NE)),                                 # grepUT
            const2d((N, NE)),                                 # gdUT
            const2d((1, NE)),                                 # nmU
            const2d((THC, THC)),                              # Wm
            const2d((TH, THC)),                               # Pool
            const2d((N, NK)),                                 # gfTD
            const2d((NK, N)),                                 # grepD
            const2d((N, NK)),                                 # grepDT
            const2d((1, NK)),                                 # nmD
            const2d((THC, THC)),                              # Wb
        ],
        out_specs=[
            pl.BlockSpec((1, TH, NE), lambda b: (b, 0, 0)),
            pl.BlockSpec((1, (T - 1) * H, NK), lambda b: (b, 0, 0)),
        ],
        compiler_params=pltpu.CompilerParams(dimension_semantics=("parallel",)),
    )(feat_kernel, gdiffT, grepU, grepUT, gdUT, nmU, Wm, Pool,
      gfTD, grepD, grepDT, nmD, Wb)

    u_ew = u_out.reshape(B, T, H, N, E).transpose(0, 1, 3, 4, 2)          # (B, T, N, E, H)
    d_ew = d_out.reshape(B, T - 1, H, N, K).transpose(0, 1, 3, 4, 2)      # (B, T-1, N, K, H)
    return u_ew, d_ew


# ----------------------- pure-JAX reference (checking) ----------------------


def reference_forward(features, multiQ1, multiQ2, multiM, nn):
    B, T, N, H, C = features.shape
    K = nn.shape[1]
    E = K - 1
    pad = jnp.concatenate([features, jnp.zeros((B, T, 1, H, C), jnp.float32)], axis=2)

    idx_u = nn[:, 1:]
    gidx_u = jnp.where(idx_u == -1, N, idx_u).reshape(-1)
    fj = pad[:, :, gidx_u].reshape(B, T, N, E, H, C)
    df = features[:, :, :, None] - fj
    Mdf = jnp.einsum('hij,btnehj->btnehi', multiM, df, precision=HIGHEST)
    w = jnp.exp(-jnp.sum(Mdf ** 2, -1)) * (idx_u != -1)[None, None, :, :, None]
    deg = jnp.sum(w, 3)
    didx = jnp.where(idx_u == -1, N - 1, idx_u).reshape(-1)      # torch -1 wrap
    deg_j = deg[:, :, didx].reshape(B, T, N, E, H)
    dm = jnp.sqrt(deg[:, :, :, None] * deg_j)
    inv = jnp.where(dm > 0, 1.0 / dm, 0.0)
    inv = jnp.where(jnp.isinf(inv), 0.0, inv)
    u_ew = w * inv

    gidx_d = jnp.where(nn == -1, N, nn).reshape(-1)
    fi = pad[:, :-1, gidx_d].reshape(B, T - 1, N, K, H, C)
    fjn = features[:, 1:]
    Qi = jnp.einsum('hij,btnehj->btnehi', multiQ1, fi, precision=HIGHEST)
    Qj = jnp.einsum('hij,btnhj->btnhi', multiQ2, fjn, precision=HIGHEST)
    wd = jnp.exp(-jnp.sum(Qi * Qj[:, :, :, None], -1)) * (nn != -1)[None, None, :, :, None]
    indeg = jnp.sum(wd, 3)
    invd = jnp.where(indeg > 0, 1.0 / indeg, 0.0)
    invd = jnp.where(jnp.isinf(invd), 0.0, invd)
    d_ew = wd * invd[:, :, :, None]
    return u_ew, d_ew


# ---------------------------------- main ------------------------------------


if __name__ == "__main__":
    B, T, N, H, C, K = 2, 4, 16, 2, 8, 6   # batch, time, nodes, heads, channels, neighbors

    key = jax.random.PRNGKey(0)
    features = 0.3 * jax.random.normal(key, (B, T, N, H, C), dtype=jnp.float32)

    # Deterministic neighbor list: col 0 = self, other cols = ring neighbors, some -1.
    nn_np = np.zeros((N, K), dtype=np.int32)
    nn_np[:, 0] = np.arange(N)
    for j in range(1, K):
        nn_np[:, j] = (np.arange(N) + j) % N
    for n in range(N):
        for j in range(1, K):
            if (n + 2 * j) % 5 == 0:
                nn_np[n, j] = -1
    nearest_nodes = jnp.asarray(nn_np)

    multiQ1, multiQ2, multiM = init_params(H, C)   # Q1_init=1.2, Q2_init=0.8, M_init=1.5

    fwd = jax.jit(graph_learning_forward)
    u_ew, d_ew = fwd(features, multiQ1, multiQ2, multiM, nearest_nodes)
    jax.block_until_ready((u_ew, d_ew))

    assert u_ew.shape == (B, T, N, K - 1, H)
    assert d_ew.shape == (B, T - 1, N, K, H)

    u_ref, d_ref = reference_forward(features, multiQ1, multiQ2, multiM, nearest_nodes)
    # Tolerance accounts for the default (bf16-pass) MXU matmuls in the kernel vs the
    # f32 (HIGHEST) reference; exp(-s) amplifies the ~0.4% operand rounding slightly.
    assert jnp.allclose(u_ew, u_ref, rtol=5e-2, atol=1e-4), "undirected mismatch"
    assert jnp.allclose(d_ew, d_ref, rtol=5e-2, atol=1e-4), "directed mismatch"

    # TODO(synk): undirected_temporal_graph_from_features is dead code (not called by
    # forward, references undefined self.multiN) and is intentionally not implemented.
    print("KERNEL_OK")
</pallas_src>

<mosaic_0001>
module attributes {stable_mosaic.version = 11 : i64} {
  func.func @_graph_kernel(%arg0: i32, %arg1: memref<1x64x16xf32, #tpu.memory_space<vmem>>, %arg2: memref<16x80xf32, #tpu.memory_space<vmem>>, %arg3: memref<80x16xf32, #tpu.memory_space<vmem>>, %arg4: memref<16x80xf32, #tpu.memory_space<vmem>>, %arg5: memref<16x80xf32, #tpu.memory_space<vmem>>, %arg6: memref<1x80xf32, #tpu.memory_space<vmem>>, %arg7: memref<64x64xf32, #tpu.memory_space<vmem>>, %arg8: memref<8x64xf32, #tpu.memory_space<vmem>>, %arg9: memref<16x96xf32, #tpu.memory_space<vmem>>, %arg10: memref<96x16xf32, #tpu.memory_space<vmem>>, %arg11: memref<16x96xf32, #tpu.memory_space<vmem>>, %arg12: memref<1x96xf32, #tpu.memory_space<vmem>>, %arg13: memref<64x64xf32, #tpu.memory_space<vmem>>, %arg14: memref<1x8x80xf32, #tpu.memory_space<vmem>>, %arg15: memref<1x6x96xf32, #tpu.memory_space<vmem>>) attributes {dimension_semantics = [#tpu.dimension_semantics<parallel>], iteration_bounds = array<i64: 2>, scalar_prefetch = 0 : i64, scratch_operands = 0 : i64, tpu.core_type = #tpu.core_type<tc>, window_params = [{transform_indices = @transform_0, window_bounds = array<i64: 1, 64, 16>}, {pipeline_mode = #tpu.pipeline_mode<synchronous>, transform_indices = @transform_1, window_bounds = array<i64: 16, 80>}, {pipeline_mode = #tpu.pipeline_mode<synchronous>, transform_indices = @transform_2, window_bounds = array<i64: 80, 16>}, {pipeline_mode = #tpu.pipeline_mode<synchronous>, transform_indices = @transform_3, window_bounds = array<i64: 16, 80>}, {pipeline_mode = #tpu.pipeline_mode<synchronous>, transform_indices = @transform_4, window_bounds = array<i64: 16, 80>}, {pipeline_mode = #tpu.pipeline_mode<synchronous>, transform_indices = @transform_5, window_bounds = array<i64: 1, 80>}, {pipeline_mode = #tpu.pipeline_mode<synchronous>, transform_indices = @transform_6, window_bounds = array<i64: 64, 64>}, {pipeline_mode = #tpu.pipeline_mode<synchronous>, transform_indices = @transform_7, window_bounds = array<i64: 8, 64>}, {pipeline_mode = #tpu.pipeline_mode<synchronous>, transform_indices = @transform_8, window_bounds = array<i64: 16, 96>}, {pipeline_mode = #tpu.pipeline_mode<synchronous>, transform_indices = @transform_9, window_bounds = array<i64: 96, 16>}, {pipeline_mode = #tpu.pipeline_mode<synchronous>, transform_indices = @transform_10, window_bounds = array<i64: 16, 96>}, {pipeline_mode = #tpu.pipeline_mode<synchronous>, transform_indices = @transform_11, window_bounds = array<i64: 1, 96>}, {pipeline_mode = #tpu.pipeline_mode<synchronous>, transform_indices = @transform_12, window_bounds = array<i64: 64, 64>}, {transform_indices = @transform_13, window_bounds = array<i64: 1, 8, 80>}, {transform_indices = @transform_14, window_bounds = array<i64: 1, 6, 96>}]} {
    %c0 = arith.constant 0 : index
    %c0_0 = arith.constant 0 : index
    %c0_1 = arith.constant 0 : index
    %0 = vector.load %arg1[%c0, %c0_0, %c0_1] : memref<1x64x16xf32, #tpu.memory_space<vmem>>, vector<1x64x16xf32>
    %1 = vector.shape_cast %0 : vector<1x64x16xf32> to vector<64x16xf32>
    %c0_2 = arith.constant 0 : index
    %c0_3 = arith.constant 0 : index
    %2 = vector.load %arg7[%c0_2, %c0_3] : memref<64x64xf32, #tpu.memory_space<vmem>>, vector<64x64xf32>
    %cst = arith.constant dense<0.000000e+00> : vector<64x16xf32>
    %3 = tpu.matmul %2, %1, %cst {dimension_numbers = #tpu.dot_dimension_numbers<[1], [0], [0], [1], [0, 0, 1, 1], [], []>} : vector<64x64xf32>, vector<64x16xf32>, vector<64x16xf32> -> vector<64x16xf32>
    %c0_4 = arith.constant 0 : index
    %c0_5 = arith.constant 0 : index
    %4 = vector.load %arg2[%c0_4, %c0_5] : memref<16x80xf32, #tpu.memory_space<vmem>>, vector<16x80xf32>
    %cst_6 = arith.constant dense<0.000000e+00> : vector<64x80xf32>
    %5 = tpu.matmul %3, %4, %cst_6 {dimension_numbers = #tpu.dot_dimension_numbers<[1], [0], [0], [1], [0, 0, 1, 1], [], []>} : vector<64x16xf32>, vector<16x80xf32>, vector<64x80xf32> -> vector<64x80xf32>
    %c0_7 = arith.constant 0 : index
    %c0_8 = arith.constant 0 : index
    %6 = vector.load %arg8[%c0_7, %c0_8] : memref<8x64xf32, #tpu.memory_space<vmem>>, vector<8x64xf32>
    %7 = arith.mulf %5, %5 : vector<64x80xf32>
    %cst_9 = arith.constant dense<0.000000e+00> : vector<8x80xf32>
    %8 = tpu.matmul %6, %7, %cst_9 {dimension_numbers = #tpu.dot_dimension_numbers<[1], [0], [0], [1], [0, 0, 1, 1], [], []>} : vector<8x64xf32>, vector<64x80xf32>, vector<8x80xf32> -> vector<8x80xf32>
    %cst_10 = arith.constant 0.000000e+00 : f32
    %9 = vector.broadcast %cst_10 : f32 to vector<8x80xf32>
    %10 = arith.subf %9, %8 : vector<8x80xf32>
    %11 = math.exp %10 : vector<8x80xf32>
    %c0_11 = arith.constant 0 : index
    %c0_12 = arith.constant 0 : index
    %12 = vector.load %arg6[%c0_11, %c0_12] : memref<1x80xf32, #tpu.memory_space<vmem>>, vector<1x80xf32>
    %13 = vector.broadcast %12 : vector<1x80xf32> to vector<8x80xf32>
    %14 = arith.mulf %11, %13 : vector<8x80xf32>
    %c0_13 = arith.constant 0 : index
    %c0_14 = arith.constant 0 : index
    %15 = vector.load %arg3[%c0_13, %c0_14] : memref<80x16xf32, #tpu.memory_space<vmem>>, vector<80x16xf32>
    %cst_15 = arith.constant dense<0.000000e+00> : vector<8x16xf32>
    %16 = tpu.matmul %14, %15, %cst_15 {dimension_numbers = #tpu.dot_dimension_numbers<[1], [0], [0], [1], [0, 0, 1, 1], [], []>} : vector<8x80xf32>, vector<80x16xf32>, vector<8x16xf32> -> vector<8x16xf32>
    %c0_16 = arith.constant 0 : index
    %c0_17 = arith.constant 0 : index
    %17 = vector.load %arg4[%c0_16, %c0_17] : memref<16x80xf32, #tpu.memory_space<vmem>>, vector<16x80xf32>
    %cst_18 = arith.constant dense<0.000000e+00> : vector<8x80xf32>
    %18 = tpu.matmul %16, %17, %cst_18 {dimension_numbers = #tpu.dot_dimension_numbers<[1], [0], [0], [1], [0, 0, 1, 1], [], []>} : vector<8x16xf32>, vector<16x80xf32>, vector<8x80xf32> -> vector<8x80xf32>
    %c0_19 = arith.constant 0 : index
    %c0_20 = arith.constant 0 : index
    %19 = vector.load %arg5[%c0_19, %c0_20] : memref<16x80xf32, #tpu.memory_space<vmem>>, vector<16x80xf32>
    %cst_21 = arith.constant dense<0.000000e+00> : vector<8x80xf32>
    %20 = tpu.matmul %16, %19, %cst_21 {dimension_numbers = #tpu.dot_dimension_numbers<[1], [0], [0], [1], [0, 0, 1, 1], [], []>} : vector<8x16xf32>, vector<16x80xf32>, vector<8x80xf32> -> vector<8x80xf32>
    %21 = arith.mulf %18, %20 : vector<8x80xf32>
    %cst_22 = arith.constant 0.000000e+00 : f32
    %22 = vector.broadcast %cst_22 : f32 to vector<8x80xf32>
    %23 = arith.cmpf ogt, %21, %22 : vector<8x80xf32>
    %24 = math.rsqrt %21 : vector<8x80xf32>
    %cst_23 = arith.constant 0.000000e+00 : f32
    %25 = vector.broadcast %cst_23 : f32 to vector<8x80xf32>
    %26 = arith.select %23, %24, %25 : vector<8x80xi1>, vector<8x80xf32>
    %27 = arith.mulf %14, %26 : vector<8x80xf32>
    %c0_24 = arith.constant 0 : index
    %c0_25 = arith.constant 0 : index
    %c0_26 = arith.constant 0 : index
    %28 = vector.load %arg14[%c0_24, %c0_25, %c0_26] : memref<1x8x80xf32, #tpu.memory_space<vmem>>, vector<1x8x80xf32>
    %29 = vector.shape_cast %28 : vector<1x8x80xf32> to vector<8x80xf32>
    %30 = vector.shape_cast %27 : vector<8x80xf32> to vector<1x8x80xf32>
    tpu.vector_store %arg14[%c0_24, %c0_25, %c0_26], %30 {strides = array<i32>} : memref<1x8x80xf32, #tpu.memory_space<vmem>>, vector<1x8x80xf32>,
    %31 = vector.extract_strided_slice %1 {offsets = [0, 0], sizes = [48, 16], strides = [1, 1]} : vector<64x16xf32> to vector<48x16xf32>
    %c0_27 = arith.constant 0 : index
    %c0_28 = arith.constant 0 : index
    %32 = vector.load %arg13[%c0_27, %c0_28] : memref<64x64xf32, #tpu.memory_space<vmem>>, vector<64x64xf32>
    %cst_29 = arith.constant dense<0.000000e+00> : vector<64x16xf32>
    %33 = tpu.matmul %32, %1, %cst_29 {dimension_numbers = #tpu.dot_dimension_numbers<[1], [0], [0], [1], [0, 0, 1, 1], [], []>} : vector<64x64xf32>, vector<64x16xf32>, vector<64x16xf32> -> vector<64x16xf32>
    %34 = vector.extract_strided_slice %33 {offsets = [16, 0], sizes = [48, 16], strides = [1, 1]} : vector<64x16xf32> to vector<48x16xf32>
    %c0_30 = arith.constant 0 : index
    %c0_31 = arith.constant 0 : index
    %35 = vector.load %arg9[%c0_30, %c0_31] : memref<16x96xf32, #tpu.memory_space<vmem>>, vector<16x96xf32>
    %cst_32 = arith.constant dense<0.000000e+00> : vector<48x96xf32>
    %36 = tpu.matmul %31, %35, %cst_32 {dimension_numbers = #tpu.dot_dimension_numbers<[1], [0], [0], [1], [0, 0, 1, 1], [], []>} : vector<48x16xf32>, vector<16x96xf32>, vector<48x96xf32> -> vector<48x96xf32>
    %c0_33 = arith.constant 0 : index
    %c0_34 = arith.constant 0 : index
    %37 = vector.load %arg11[%c0_33, %c0_34] : memref<16x96xf32, #tpu.memory_space<vmem>>, vector<16x96xf32>
    %cst_35 = arith.constant dense<0.000000e+00> : vector<48x96xf32>
    %38 = tpu.matmul %34, %37, %cst_35 {dimension_numbers = #tpu.dot_dimension_numbers<[1], [0], [0], [1], [0, 0, 1, 1], [], []>} : vector<48x16xf32>, vector<16x96xf32>, vector<48x96xf32> -> vector<48x96xf32>
    %c0_36 = arith.constant 0 : index
    %c0_37 = arith.constant 0 : index
    %39 = vector.load %arg8[%c0_36, %c0_37] : memref<8x64xf32, #tpu.memory_space<vmem>>, vector<8x64xf32>
    %40 = vector.extract_strided_slice %39 {offsets = [0, 0], sizes = [6, 48], strides = [1, 1]} : vector<8x64xf32> to vector<6x48xf32>
    %41 = arith.mulf %36, %38 : vector<48x96xf32>
    %cst_38 = arith.constant dense<0.000000e+00> : vector<6x96xf32>
    %42 = tpu.matmul %40, %41, %cst_38 {dimension_numbers = #tpu.dot_dimension_numbers<[1], [0], [0], [1], [0, 0, 1, 1], [], []>} : vector<6x48xf32>, vector<48x96xf32>, vector<6x96xf32> -> vector<6x96xf32>
    %cst_39 = arith.constant 0.000000e+00 : f32
    %43 = vector.broadcast %cst_39 : f32 to vector<6x96xf32>
    %44 = arith.subf %43, %42 : vector<6x96xf32>
    %45 = math.exp %44 : vector<6x96xf32>
    %c0_40 = arith.constant 0 : index
    %c0_41 = arith.constant 0 : index
    %46 = vector.load %arg12[%c0_40, %c0_41] : memref<1x96xf32, #tpu.memory_space<vmem>>, vector<1x96xf32>
    %47 = vector.broadcast %46 : vector<1x96xf32> to vector<6x96xf32>
    %48 = arith.mulf %45, %47 : vector<6x96xf32>
    %c0_42 = arith.constant 0 : index
    %c0_43 = arith.constant 0 : index
    %49 = vector.load %arg10[%c0_42, %c0_43] : memref<96x16xf32, #tpu.memory_space<vmem>>, vector<96x16xf32>
    %cst_44 = arith.constant dense<0.000000e+00> : vector<6x16xf32>
    %50 = tpu.matmul %48, %49, %cst_44 {dimension_numbers = #tpu.dot_dimension_numbers<[1], [0], [0], [1], [0, 0, 1, 1], [], []>} : vector<6x96xf32>, vector<96x16xf32>, vector<6x16xf32> -> vector<6x16xf32>
    %c0_45 = arith.constant 0 : index
    %c0_46 = arith.constant 0 : index
    %51 = vector.load %arg11[%c0_45, %c0_46] : memref<16x96xf32, #tpu.memory_space<vmem>>, vector<16x96xf32>
    %cst_47 = arith.constant dense<0.000000e+00> : vector<6x96xf32>
    %52 = tpu.matmul %50, %51, %cst_47 {dimension_numbers = #tpu.dot_dimension_numbers<[1], [0], [0], [1], [0, 0, 1, 1], [], []>} : vector<6x16xf32>, vector<16x96xf32>, vector<6x96xf32> -> vector<6x96xf32>
    %cst_48 = arith.constant 0.000000e+00 : f32
    %53 = vector.broadcast %cst_48 : f32 to vector<6x96xf32>
    %54 = arith.cmpf ogt, %52, %53 : vector<6x96xf32>
    %55 = tpu.reciprocal %52 {approx = true} : vector<6x96xf32> -> vector<6x96xf32>
    %cst_49 = arith.constant 0.000000e+00 : f32
    %56 = vector.broadcast %cst_49 : f32 to vector<6x96xf32>
    %57 = arith.select %54, %55, %56 : vector<6x96xi1>, vector<6x96xf32>
    %58 = arith.mulf %48, %57 : vector<6x96xf32>
    %c0_50 = arith.constant 0 : index
    %c0_51 = arith.constant 0 : index
    %c0_52 = arith.constant 0 : index
    %59 = vector.load %arg15[%c0_50, %c0_51, %c0_52] : memref<1x6x96xf32, #tpu.memory_space<vmem>>, vector<1x6x96xf32>
    %60 = vector.shape_cast %59 : vector<1x6x96xf32> to vector<6x96xf32>
    %61 = vector.shape_cast %58 : vector<6x96xf32> to vector<1x6x96xf32>
    tpu.vector_store %arg15[%c0_50, %c0_51, %c0_52], %61 {strides = array<i32>} : memref<1x6x96xf32, #tpu.memory_space<vmem>>, vector<1x6x96xf32>,
    return
  }
  func.func @transform_0(%arg0: i32) -> (i32, i32, i32) {
    %c0_i32 = arith.constant 0 : i32
    %c0_i32_0 = arith.constant 0 : i32
    %c0_i32_1 = arith.constant 0 : i32
    return %arg0, %c0_i32, %c0_i32_0 : i32, i32, i32
  }
  func.func @transform_1(%arg0: i32) -> (i32, i32) {
    %c0_i32 = arith.constant 0 : i32
    %c0_i32_0 = arith.constant 0 : i32
    %c0_i32_1 = arith.constant 0 : i32
    return %c0_i32, %c0_i32_0 : i32, i32
  }
  func.func @transform_2(%arg0: i32) -> (i32, i32) {
    %c0_i32 = arith.constant 0 : i32
    %c0_i32_0 = arith.constant 0 : i32
    %c0_i32_1 = arith.constant 0 : i32
    return %c0_i32, %c0_i32_0 : i32, i32
  }
  func.func @transform_3(%arg0: i32) -> (i32, i32) {
    %c0_i32 = arith.constant 0 : i32
    %c0_i32_0 = arith.constant 0 : i32
    %c0_i32_1 = arith.constant 0 : i32
    return %c0_i32, %c0_i32_0 : i32, i32
  }
  func.func @transform_4(%arg0: i32) -> (i32, i32) {
    %c0_i32 = arith.constant 0 : i32
    %c0_i32_0 = arith.constant 0 : i32
    %c0_i32_1 = arith.constant 0 : i32
    return %c0_i32, %c0_i32_0 : i32, i32
  }
  func.func @transform_5(%arg0: i32) -> (i32, i32) {
    %c0_i32 = arith.constant 0 : i32
    %c0_i32_0 = arith.constant 0 : i32
    %c0_i32_1 = arith.constant 0 : i32
    return %c0_i32, %c0_i32_0 : i32, i32
  }
  func.func @transform_6(%arg0: i32) -> (i32, i32) {
    %c0_i32 = arith.constant 0 : i32
    %c0_i32_0 = arith.constant 0 : i32
    %c0_i32_1 = arith.constant 0 : i32
    return %c0_i32, %c0_i32_0 : i32, i32
  }
  func.func @transform_7(%arg0: i32) -> (i32, i32) {
    %c0_i32 = arith.constant 0 : i32
    %c0_i32_0 = arith.constant 0 : i32
    %c0_i32_1 = arith.constant 0 : i32
    return %c0_i32, %c0_i32_0 : i32, i32
  }
  func.func @transform_8(%arg0: i32) -> (i32, i32) {
    %c0_i32 = arith.constant 0 : i32
    %c0_i32_0 = arith.constant 0 : i32
    %c0_i32_1 = arith.constant 0 : i32
    return %c0_i32, %c0_i32_0 : i32, i32
  }
  func.func @transform_9(%arg0: i32) -> (i32, i32) {
    %c0_i32 = arith.constant 0 : i32
    %c0_i32_0 = arith.constant 0 : i32
    %c0_i32_1 = arith.constant 0 : i32
    return %c0_i32, %c0_i32_0 : i32, i32
  }
  func.func @transform_10(%arg0: i32) -> (i32, i32) {
    %c0_i32 = arith.constant 0 : i32
    %c0_i32_0 = arith.constant 0 : i32
    %c0_i32_1 = arith.constant 0 : i32
    return %c0_i32, %c0_i32_0 : i32, i32
  }
  func.func @transform_11(%arg0: i32) -> (i32, i32) {
    %c0_i32 = arith.constant 0 : i32
    %c0_i32_0 = arith.constant 0 : i32
    %c0_i32_1 = arith.constant 0 : i32
    return %c0_i32, %c0_i32_0 : i32, i32
  }
  func.func @transform_12(%arg0: i32) -> (i32, i32) {
    %c0_i32 = arith.constant 0 : i32
    %c0_i32_0 = arith.constant 0 : i32
    %c0_i32_1 = arith.constant 0 : i32
    return %c0_i32, %c0_i32_0 : i32, i32
  }
  func.func @transform_13(%arg0: i32) -> (i32, i32, i32) {
    %c0_i32 = arith.constant 0 : i32
    %c0_i32_0 = arith.constant 0 : i32
    %c0_i32_1 = arith.constant 0 : i32
    return %arg0, %c0_i32, %c0_i32_0 : i32, i32, i32
  }
  func.func @transform_14(%arg0: i32) -> (i32, i32, i32) {
    %c0_i32 = arith.constant 0 : i32
    %c0_i32_0 = arith.constant 0 : i32
    %c0_i32_1 = arith.constant 0 : i32
    return %arg0, %c0_i32, %c0_i32_0 : i32, i32, i32
  }
}

</mosaic_0001>

<bundles_post_ra>
// kernel: eq.38
= control target key start
LH: loop header
LB: loop body
LE: loop exit
PB: predicated region body
PF: predicated region fallthrough
CT: control target
= control target key end

     0   :  { %s131_s10 = smov 75   ;;  %s132_s11 = smov 65   ;;  %vm3_vm0 = vcmask 39936   ;;  %vm9_vm1 = vcmask 654936   ;;  %vm15_vm2 = vcmask 613936   ;;  %vm21_vm3 = vcmask 572936   ;;  %s207_s0 = inlined_call_operand.vmem [shape: s32[16,5], index: 0, kind: input, shape index: {}]   ;;  %s208_s1 = inlined_call_operand.vmem [shape: s32[80], index: 1, kind: output, shape index: {}]  }
   0x1   :  { %v101_v0 = vld [vmem:[%s207_s0 + $0xf] sm:$0x1]   ;;  %v103_v1 = vld [vmem:[%s207_s0 + $0xd] sm:$0x1]   ;;  %v105_v2 = vld [vmem:[%s207_s0 + $0xb] sm:$0x1]  }
   0x2   :  { %7 = vrot.lane.b32.xlu0 %v101_v0, %s131_s10  ;;  %19 = vrot.lane.b32.xlu1 %v103_v1, %s132_s11  ;;  %s133_s14 = smov 55   ;;  %v102_v3 = vld [vmem:[%s207_s0 + $0xe] sm:$0x1]   ;;  %v104_v4 = vld [vmem:[%s207_s0 + $0xc] sm:$0x1]   ;;  %s134_s19 = smov 70  }
   0x3   :  { %31 = vrot.lane.b32.xlu2 %v105_v2, %s133_s14  ;;  %s135_s20 = smov 60   ;;  %v106_v5 = vld [vmem:[%s207_s0 + $0xa] sm:$0x1]   ;;  %s136_s23 = smov 50   ;;  %v107_v6 = vld [vmem:[%s207_s0 + $0x9] sm:$0x1]  }
   0x4   :  { %v108_v7 = vld [vmem:[%s207_s0 + $0x8] sm:$0x1]   ;;  %s137_s28 = smov 45   ;;  %s138_s29 = smov 40   ;;  %v109_v8 = vld [vmem:[%s207_s0 + $0x7] sm:$0x1]  }
   0x5   :  { %s139_s3 = smov 35   ;;  %v110_v9 = vld [vmem:[%s207_s0 + $0x6] sm:$0x1]   ;;  %v111_v10 = vld [vmem:[%s207_s0 + $0x5] sm:$0x1]   ;;  %s140_s8 = smov 30  }
   0x6   :  { %s141_s9 = smov 25   ;;  %v112_v11 = vld [vmem:[%s207_s0 + $0x4] sm:$0x1]   ;;  %s142_s12 = smov 20   ;;  %v113_v12 = vld [vmem:[%s207_s0 + $0x3] sm:$0x1]  }
   0x7   :  { %v114_v13 = vld [vmem:[%s207_s0 + $0x2] sm:$0x1]   ;;  %s143_s17 = smov 15   ;;  %s144_s18 = smov 10   ;;  %v115_v14 = vld [vmem:[%s207_s0 + $0x1] sm:$0x1]  }
   0x8   :  { %s145_s21 = smov 5   ;;  %v2_v15 = vld [vmem:[%s207_s0] sm:$0x1]   ;;  %vm27_vm4 = vcmask 531936   ;;  %vm33_vm5 = vcmask 490936   ;;  %vm39_vm6 = vcmask 449936  }
   0x9   :  { %4 = vst.msk [vmem:[#allocation0] sm:$0x1] %vm3_vm0, %v2_v15   ;;  %vm45_vm7 = vcmask 408936   ;;  %vm51_vm8 = vcmask 367936   ;;  %vm57_vm9 = vcmask 326936   ;;  %vm63_vm10 = vcmask 285936  }
   0xa   :  { %13 = vrot.lane.b32.xlu0 %v102_v3, %s134_s19  ;;  %25 = vrot.lane.b32.xlu1 %v104_v4, %s135_s20  ;;  %vm69_vm11 = vcmask 244936   ;;  %vm75_vm12 = vcmask 203936   ;;  %vm81_vm13 = vcmask 162936   ;;  %vm87_vm14 = vcmask 121936  }
   0xb   :  { %37 = vrot.lane.b32.xlu2 %v106_v5, %s136_s23  ;;  %vm93_vm15 = vcmask 80936  }
  0x12   :  { %43 = vrot.lane.b32.xlu0 %v107_v6, %s137_s28  ;;  %49 = vrot.lane.b32.xlu1 %v108_v7, %s138_s29 }
  0x13   :  { %55 = vrot.lane.b32.xlu2 %v109_v8, %s139_s3 }
  0x1a   :  { %61 = vrot.lane.b32.xlu0 %v110_v9, %s140_s8  ;;  %67 = vrot.lane.b32.xlu1 %v111_v10, %s141_s9 }
  0x1b   :  { %73 = vrot.lane.b32.xlu2 %v112_v11, %s142_s12 }
  0x22   :  { %79 = vrot.lane.b32.xlu0 %v113_v12, %s143_s17  ;;  %85 = vrot.lane.b32.xlu1 %v114_v13, %s144_s18 }
  0x23   :  { %91 = vrot.lane.b32.xlu2 %v115_v14, %s145_s21 }
  0x5d   :  { %v32_v16 = vpop.permute.xlu2 %31  }
  0x65   :  { %v38_v17 = vpop.permute.xlu2 %37  }
  0x6d   :  { %v56_v18 = vpop.permute.xlu2 %55  }
  0x74   :  { %v8_v19 = vpop.permute.xlu0 %7   ;;  %v20_v20 = vpop.permute.xlu1 %19  }
  0x75   :  { %10 = vst.msk [vmem:[#allocation0] sm:$0x1] %vm9_vm1, %v8_v19   ;;  %v74_v21 = vpop.permute.xlu2 %73  }
  0x7c   :  { %v14_v22 = vpop.permute.xlu0 %13   ;;  %v26_v23 = vpop.permute.xlu1 %25  }
  0x7d   :  { %16 = vst.msk [vmem:[#allocation0] sm:$0x1] %vm15_vm2, %v14_v22   ;;  %v92_v24 = vpop.permute.xlu2 %91  }
  0x7e   :  { %22 = vst.msk [vmem:[#allocation0] sm:$0x1] %vm21_vm3, %v20_v20  }
  0x7f   :  { %28 = vst.msk [vmem:[#allocation0] sm:$0x1] %vm27_vm4, %v26_v23  }
  0x80   :  { %34 = vst.msk [vmem:[#allocation0] sm:$0x1] %vm33_vm5, %v32_v16  }
  0x81   :  { %40 = vst.msk [vmem:[#allocation0] sm:$0x1] %vm39_vm6, %v38_v17  }
  0x84   :  { %v44_v25 = vpop.permute.xlu0 %43   ;;  %v50_v26 = vpop.permute.xlu1 %49  }
  0x85   :  { %46 = vst.msk [vmem:[#allocation0] sm:$0x1] %vm45_vm7, %v44_v25  }
  0x86   :  { %52 = vst.msk [vmem:[#allocation0] sm:$0x1] %vm51_vm8, %v50_v26  }
  0x87   :  { %58 = vst.msk [vmem:[#allocation0] sm:$0x1] %vm57_vm9, %v56_v18  }
  0x8c   :  { %v62_v27 = vpop.permute.xlu0 %61   ;;  %v68_v28 = vpop.permute.xlu1 %67  }
  0x8d   :  { %64 = vst.msk [vmem:[#allocation0] sm:$0x1] %vm63_vm10, %v62_v27  }
  0x8e   :  { %70 = vst.msk [vmem:[#allocation0] sm:$0x1] %vm69_vm11, %v68_v28  }
  0x8f   :  { %76 = vst.msk [vmem:[#allocation0] sm:$0x1] %vm75_vm12, %v74_v21  }
  0x94   :  { %v80_v29 = vpop.permute.xlu0 %79   ;;  %v86_v30 = vpop.permute.xlu1 %85  }
  0x95   :  { %82 = vst.msk [vmem:[#allocation0] sm:$0x1] %vm81_vm13, %v80_v29  }
  0x96   :  { %88 = vst.msk [vmem:[#allocation0] sm:$0x1] %vm87_vm14, %v86_v30  }
  0x97   :  { %94 = vst.msk [vmem:[#allocation0] sm:$0x1] %vm93_vm15, %v92_v24  }
  0x9e   :  { %v97_v31 = vld [vmem:[#allocation0] sm:$0x1] }
  0x9f   :  { %100 = vst [vmem:[%s208_s1] sm:$0x1] %v97_v31 }

// kernel: eq.66
= control target key start
LH: loop header
LB: loop body
LE: loop exit
PB: predicated region body
PF: predicated region fallthrough
CT: control target
= control target key end

     0   :  { %s131_s10 = smov 90   ;;  %s132_s11 = smov 78   ;;  %vm3_vm0 = vcmask 48128   ;;  %vm9_vm1 = vcmask 786128   ;;  %vm15_vm2 = vcmask 736928   ;;  %vm21_vm3 = vcmask 687728   ;;  %s207_s0 = inlined_call_operand.vmem [shape: s32[16,6], index: 0, kind: input, shape index: {}]   ;;  %s208_s1 = inlined_call_operand.vmem [shape: s32[96], index: 1, kind: output, shape index: {}]  }
   0x1   :  { %v101_v0 = vld [vmem:[%s207_s0 + $0xf] sm:$0x1]   ;;  %v103_v1 = vld [vmem:[%s207_s0 + $0xd] sm:$0x1]   ;;  %v105_v2 = vld [vmem:[%s207_s0 + $0xb] sm:$0x1]  }
   0x2   :  { %7 = vrot.lane.b32.xlu0 %v101_v0, %s131_s10  ;;  %19 = vrot.lane.b32.xlu1 %v103_v1, %s132_s11  ;;  %s133_s14 = smov 66   ;;  %v102_v3 = vld [vmem:[%s207_s0 + $0xe] sm:$0x1]   ;;  %v104_v4 = vld [vmem:[%s207_s0 + $0xc] sm:$0x1]   ;;  %s134_s19 = smov 84  }
   0x3   :  { %31 = vrot.lane.b32.xlu2 %v105_v2, %s133_s14  ;;  %s135_s20 = smov 72   ;;  %v106_v5 = vld [vmem:[%s207_s0 + $0xa] sm:$0x1]   ;;  %s136_s23 = smov 60   ;;  %v107_v6 = vld [vmem:[%s207_s0 + $0x9] sm:$0x1]  }
   0x4   :  { %v108_v7 = vld [vmem:[%s207_s0 + $0x8] sm:$0x1]   ;;  %s137_s28 = smov 54   ;;  %s138_s29 = smov 48   ;;  %v109_v8 = vld [vmem:[%s207_s0 + $0x7] sm:$0x1]  }
   0x5   :  { %s139_s3 = smov 42   ;;  %v110_v9 = vld [vmem:[%s207_s0 + $0x6] sm:$0x1]   ;;  %v111_v10 = vld [vmem:[%s207_s0 + $0x5] sm:$0x1]   ;;  %s140_s8 = smov 36  }
   0x6   :  { %s141_s9 = smov 30   ;;  %v112_v11 = vld [vmem:[%s207_s0 + $0x4] sm:$0x1]   ;;  %s142_s12 = smov 24   ;;  %v113_v12 = vld [vmem:[%s207_s0 + $0x3] sm:$0x1]  }
   0x7   :  { %v114_v13 = vld [vmem:[%s207_s0 + $0x2] sm:$0x1]   ;;  %s143_s17 = smov 18   ;;  %s144_s18 = smov 12   ;;  %v115_v14 = vld [vmem:[%s207_s0 + $0x1] sm:$0x1]  }
   0x8   :  { %s145_s21 = smov 6   ;;  %v2_v15 = vld [vmem:[%s207_s0] sm:$0x1]   ;;  %vm27_vm4 = vcmask 638528   ;;  %vm33_vm5 = vcmask 589328   ;;  %vm39_vm6 = vcmask 540128  }
   0x9   :  { %4 = vst.msk [vmem:[#allocation0] sm:$0x1] %vm3_vm0, %v2_v15   ;;  %vm45_vm7 = vcmask 490928   ;;  %vm51_vm8 = vcmask 441728   ;;  %vm57_vm9 = vcmask 392528   ;;  %vm63_vm10 = vcmask 343328  }
   0xa   :  { %13 = vrot.lane.b32.xlu0 %v102_v3, %s134_s19  ;;  %25 = vrot.lane.b32.xlu1 %v104_v4, %s135_s20  ;;  %vm69_vm11 = vcmask 294128   ;;  %vm75_vm12 = vcmask 244928   ;;  %vm81_vm13 = vcmask 195728   ;;  %vm87_vm14 = vcmask 146528  }
   0xb   :  { %37 = vrot.lane.b32.xlu2 %v106_v5, %s136_s23  ;;  %vm93_vm15 = vcmask 97328  }
  0x12   :  { %43 = vrot.lane.b32.xlu0 %v107_v6, %s137_s28  ;;  %49 = vrot.lane.b32.xlu1 %v108_v7, %s138_s29 }
  0x13   :  { %55 = vrot.lane.b32.xlu2 %v109_v8, %s139_s3 }
  0x1a   :  { %61 = vrot.lane.b32.xlu0 %v110_v9, %s140_s8  ;;  %67 = vrot.lane.b32.xlu1 %v111_v10, %s141_s9 }
  0x1b   :  { %73 = vrot.lane.b32.xlu2 %v112_v11, %s142_s12 }
  0x22   :  { %79 = vrot.lane.b32.xlu0 %v113_v12, %s143_s17  ;;  %85 = vrot.lane.b32.xlu1 %v114_v13, %s144_s18 }
  0x23   :  { %91 = vrot.lane.b32.xlu2 %v115_v14, %s145_s21 }
  0x5d   :  { %v32_v16 = vpop.permute.xlu2 %31  }
  0x65   :  { %v38_v17 = vpop.permute.xlu2 %37  }
  0x6d   :  { %v56_v18 = vpop.permute.xlu2 %55  }
  0x74   :  { %v8_v19 = vpop.permute.xlu0 %7   ;;  %v20_v20 = vpop.permute.xlu1 %19  }
  0x75   :  { %10 = vst.msk [vmem:[#allocation0] sm:$0x1] %vm9_vm1, %v8_v19   ;;  %v74_v21 = vpop.permute.xlu2 %73  }
  0x7c   :  { %v14_v22 = vpop.permute.xlu0 %13   ;;  %v26_v23 = vpop.permute.xlu1 %25  }
  0x7d   :  { %16 = vst.msk [vmem:[#allocation0] sm:$0x1] %vm15_vm2, %v14_v22   ;;  %v92_v24 = vpop.permute.xlu2 %91  }
  0x7e   :  { %22 = vst.msk [vmem:[#allocation0] sm:$0x1] %vm21_vm3, %v20_v20  }
  0x7f   :  { %28 = vst.msk [vmem:[#allocation0] sm:$0x1] %vm27_vm4, %v26_v23  }
  0x80   :  { %34 = vst.msk [vmem:[#allocation0] sm:$0x1] %vm33_vm5, %v32_v16  }
  0x81   :  { %40 = vst.msk [vmem:[#allocation0] sm:$0x1] %vm39_vm6, %v38_v17  }
  0x84   :  { %v44_v25 = vpop.permute.xlu0 %43   ;;  %v50_v26 = vpop.permute.xlu1 %49  }
  0x85   :  { %46 = vst.msk [vmem:[#allocation0] sm:$0x1] %vm45_vm7, %v44_v25  }
  0x86   :  { %52 = vst.msk [vmem:[#allocation0] sm:$0x1] %vm51_vm8, %v50_v26  }
  0x87   :  { %58 = vst.msk [vmem:[#allocation0] sm:$0x1] %vm57_vm9, %v56_v18  }
  0x8c   :  { %v62_v27 = vpop.permute.xlu0 %61   ;;  %v68_v28 = vpop.permute.xlu1 %67  }
  0x8d   :  { %64 = vst.msk [vmem:[#allocation0] sm:$0x1] %vm63_vm10, %v62_v27  }
  0x8e   :  { %70 = vst.msk [vmem:[#allocation0] sm:$0x1] %vm69_vm11, %v68_v28  }
  0x8f   :  { %76 = vst.msk [vmem:[#allocation0] sm:$0x1] %vm75_vm12, %v74_v21  }
  0x94   :  { %v80_v29 = vpop.permute.xlu0 %79   ;;  %v86_v30 = vpop.permute.xlu1 %85  }
  0x95   :  { %82 = vst.msk [vmem:[#allocation0] sm:$0x1] %vm81_vm13, %v80_v29  }
  0x96   :  { %88 = vst.msk [vmem:[#allocation0] sm:$0x1] %vm87_vm14, %v86_v30  }
  0x97   :  { %94 = vst.msk [vmem:[#allocation0] sm:$0x1] %vm93_vm15, %v92_v24  }
  0x9e   :  { %v97_v31 = vld [vmem:[#allocation0] sm:$0x1] }
  0x9f   :  { %100 = vst [vmem:[%s208_s1] sm:$0x1] %v97_v31 }

// kernel: graph_learning_forward.1
= control target key start
LH: loop header
LB: loop body
LE: loop exit
PB: predicated region body
PF: predicated region fallthrough
CT: control target
= control target key end

     0   :  { %s1288_s29 = smov 0   ;;  %s1561_s0 = inlined_call_operand.vmem [shape: f32[2,64,16], index: 0, kind: input, shape index: {}]   ;;  %s1562_s1 = inlined_call_operand.vmem [shape: f32[16,80], index: 1, kind: input, shape index: {}]   ;;  %s1563_s2 = inlined_call_operand.vmem [shape: f32[80,16], index: 2, kind: input, shape index: {}]   ;;  %s1564_s3 = inlined_call_operand.vmem [shape: f32[16,80], index: 3, kind: input, shape index: {}]   ;;  %s1565_s4 = inlined_call_operand.vmem [shape: f32[16,80], index: 4, kind: input, shape index: {}]   ;;  %s1566_s5 = inlined_call_operand.vmem [shape: f32[1,80], index: 5, kind: input, shape index: {}]   ;;  %s1567_s6 = inlined_call_operand.vmem [shape: f32[64,64], index: 6, kind: input, shape index: {}]   ;;  %s1568_s7 = inlined_call_operand.vmem [shape: f32[8,64], index: 7, kind: input, shape index: {}]   ;;  %s1569_s8 = inlined_call_operand.vmem [shape: f32[16,96], index: 8, kind: input, shape index: {}]   ;;  %s1570_s9 = inlined_call_operand.vmem [shape: f32[96,16], index: 9, kind: input, shape index: {}]   ;;  %s1571_s10 = inlined_call_operand.vmem [shape: f32[16,96], index: 10, kind: input, shape index: {}]   ;;  %s1572_s11 = inlined_call_operand.vmem [shape: f32[1,96], index: 11, kind: input, shape index: {}]   ;;  %s1573_s12 = inlined_call_operand.vmem [shape: f32[64,64], index: 12, kind: input, shape index: {}]   ;;  %s1574_s13 = inlined_call_operand.vmem [shape: f32[2,8,80], index: 13, kind: output, shape index: {0}]   ;;  %s1575_s14 = inlined_call_operand.vmem [shape: f32[2,6,96], index: 14, kind: output, shape index: {1}]  }
   0x1 LB: > { %s1132_s30 = sadd.s32 4294967295, %s1211_s29   ;;  %p1136_p0 = scmp.ge.s32.totalorder %s1211_s29, 1  ;;  %s1211_s29 = sphi %s1288_s29, %s25_s29  }
   0x2   : > { %p415_p1 = scmp.lt.s32.totalorder %s1211_s29, 3 }
   0x4   : > { %p416_p2 = pnand %p1136_p0, %p415_p1 }
   0x5   : > { %p464_p3 = scmp.lt.s32.totalorder (!%p416_p2), %s1132_s30, 1 }
   0x6   : > { %419 = sbr.rel (%p416_p2) target bundleno = 1375 (0x55f), region = 72 }
   0xb   : > { %s1577_s30 = smov (!%p464_p3, %s1132_s30), 1  ;;  %v485_v8 = vld [vmem:[%s1567_s6] sm:$0xff]  ;;  %vm493_vm0 = vcmask 523264   ;;  %v486_v9 = vld [vmem:[%s1567_s6 + $0x8] sm:$0xff]  ;;  %v487_v10 = vld [vmem:[%s1567_s6 + $0x10] sm:$0xff]  ;;  %vm561_vm1 = vcmask 130048  }
   0xc   : > { %s1186_s15 = sshll.u32 %s1577_s30, 6  ;;  %v488_v11 = vld [vmem:[%s1567_s6 + $0x18] sm:$0xff]  ;;  %v560_v12 = vld [vmem:[%s1562_s1 + $0x8] sm:$0xff]  ;;  %v489_v13 = vld [vmem:[%s1567_s6 + $0x20] sm:$0xff]  ;;  %vm677_vm2 = vcmask 654336   ;;  %s1139_s25 = sshll.u32 %s1577_s30, 3 }
   0xd   : > { %s468_s18 = scalar_lea.vmem %s1561_s0, %s1186_s15  ;;  %600 = vmatpush.msra.mxu1 %v560_v12  ;;  %v490_v14 = vld [vmem:[%s1567_s6 + $0x28] sm:$0xff]  ;;  %v491_v15 = vld [vmem:[%s1567_s6 + $0x30] sm:$0xff]  ;;  %v492_v16 = vld [vmem:[%s1567_s6 + $0x38] sm:$0xff]  ;;  %s472_s28 = scalar_lea.vmem %s1574_s13, %s1139_s25  ;;  %vm951_vm7 = vcmask 392192   ;;  %vm995_vm8 = vcmask 785408   ;;  %vm1046_vm10 = vcmask 783360  }
   0xe   : > { %v1302_v0 = vld [vmem:[%s468_s18 + $0x38] sm:$0xff]  ;;  %v1304_v1 = vld [vmem:[%s468_s18 + $0x30] sm:$0xff]  ;;  %v1307_v2 = vld [vmem:[%s468_s18 + $0x28] sm:$0xff]  ;;  %s476_s17 = scalar_lea.vmem %s1575_s14, %s1139_s25 }
   0xf   : > { %526 = vmatpush.msra.mxu0 %v1302_v0  ;;  %v1310_v3 = vld [vmem:[%s468_s18 + $0x20] sm:$0xff]  ;;  %v1313_v4 = vld [vmem:[%s468_s18 + $0x18] sm:$0xff]  ;;  %v1316_v5 = vld [vmem:[%s468_s18 + $0x10] sm:$0xff] }
  0x10   : > { %v1319_v6 = vld [vmem:[%s468_s18 + $0x8] sm:$0xff]  ;;  %v1322_v7 = vld [vmem:[%s468_s18] sm:$0xff]  ;;  %v674_v34 = vld [vmem:[%s1563_s2 + $0x38] sm:$0xff] }
  0x11   : > { %527 = vmatpush.msra.mxu0 %v1304_v1  ;;  %v559_v17 = vld [vmem:[%s1562_s1] sm:$0xff]  ;;  %v676_v32 = vld [vmem:[%s1563_s2 + $0x48] sm:$0xff]  ;;  %v673_v46 = vld [vmem:[%s1563_s2 + $0x30] sm:$0xff] }
  0x12   : > { %601 = vmatpush.msra.mxu1 %v559_v17  ;;  %v675_v33 = vld [vmem:[%s1563_s2 + $0x40] sm:$0xff]  ;;  %687 = vmatpush.msra.mxu3 %v676_v32  ;;  %v672_v47 = vld [vmem:[%s1563_s2 + $0x28] sm:$0xff]  ;;  %v670_v49 = vld [vmem:[%s1563_s2 + $0x18] sm:$0xff] }
  0x13   : > { %528 = vmatpush.msra.mxu0 %v1307_v2  ;;  %v1384_v45 = vld [vmem:[%s1568_s7] sm:$0xff]  ;;  %v669_v50 = vld [vmem:[%s1563_s2 + $0x10] sm:$0xff]  ;;  %v668_v51 = vld [vmem:[%s1563_s2 + $0x8] sm:$0xff] }
  0x14   : > { %688 = vmatpush.msra.mxu3 %v675_v33  ;;  %v671_v48 = vld [vmem:[%s1563_s2 + $0x20] sm:$0xff]  ;;  %v702_v53 = vld [vmem:[%s1564_s3 + $0x8] sm:$0xff]  ;;  %v769_v12 = vld [vmem:[%s1573_s12 + $0x30] sm:$0xff] }
  0x15   : > { %529 = vmatpush.msra.mxu0 %v1310_v3  ;;  %v667_v52 = vld [vmem:[%s1563_s2] sm:$0xff]  ;;  %v727_v55 = vld [vmem:[%s1565_s4 + $0x8] sm:$0xff] }
  0x16   : > { %689 = vmatpush.msra.mxu3 %v674_v34  ;;  %v701_v54 = vld [vmem:[%s1564_s3] sm:$0xff] }
  0x17   : > { %530 = vmatpush.msra.mxu0 %v1313_v4  ;;  %v1195_v59 = vld [vmem:[%s1566_s5] ss:$0 sm:$0xff] }
  0x18   : > { %690 = vmatpush.msra.mxu3 %v673_v46  ;;  %v726_v62 = vld [vmem:[%s1565_s4] sm:$0xff]  ;;  %v990_v46 = vld [vmem:[%s1570_s9 + $0x38] sm:$0xff] }
  0x19   : > { %531 = vmatpush.msra.mxu0 %v1316_v5  ;;  %v1484_v17 = vld [vmem:[%s1571_s10] sm:$0xff] }
  0x1a   : > { %691 = vmatpush.msra.mxu3 %v672_v47 }
  0x1b   : > { %532 = vmatpush.msra.mxu0 %v1319_v6 }
  0x1c   : > { %692 = vmatpush.msra.mxu3 %v671_v48 }
  0x1d   : > { %533 = vmatpush.msra.mxu0 %v1322_v7 }
  0x1e   : > { %1141 = vmatmul.msk.f32.vlgmr.msra.gmra.mxu0 %vm493_vm0, %v485_v8  ;;  %693 = vmatpush.msra.mxu3 %v670_v49  ;;  %v765_v8 = vld [vmem:[%s1573_s12 + $0x10] sm:$0xff] }
  0x20   : > { %694 = vmatpush.msra.mxu3 %v669_v50 }
  0x22   : > { %695 = vmatpush.msra.mxu3 %v668_v51 }
  0x24   : > { %696 = vmatpush.msra.mxu3 %v667_v52 }
  0x26   : > { %1142 = vmatmul.msk.f32.gmra.mxu0 %vm493_vm0, %v486_v9  ;;  %742 = vmatpush.msrb.mxu3 %v727_v55  ;;  %v766_v9 = vld [vmem:[%s1573_s12 + $0x18] sm:$0xff] }
  0x28   : > { %743 = vmatpush.msrb.mxu3 %v726_v62 }
  0x2e   : > { %1143 = vmatmul.msk.f32.gmra.mxu0 %vm493_vm0, %v487_v10  ;;  %v767_v10 = vld [vmem:[%s1573_s12 + $0x20] sm:$0xff] }
  0x36   : > { %1144 = vmatmul.msk.f32.gmra.mxu0 %vm493_vm0, %v488_v11  ;;  %v768_v11 = vld [vmem:[%s1573_s12 + $0x28] sm:$0xff] }
  0x3e   : > { %1145 = vmatmul.msk.f32.gmra.mxu0 %vm493_vm0, %v489_v13  ;;  %v770_v13 = vld [vmem:[%s1573_s12 + $0x38] sm:$0xff] }
  0x46   : > { %1146 = vmatmul.msk.f32.gmra.mxu0 %vm493_vm0, %v490_v14  ;;  %v835_v14 = vld [vmem:[%s1569_s8 + $0x8] sm:$0xff] }
  0x4e   : > { %1147 = vmatmul.msk.f32.gmra.mxu0 %vm493_vm0, %v491_v15  ;;  %v834_v15 = vld [vmem:[%s1569_s8] sm:$0xff] }
  0x56   : > { %1148 = vmatmul.msk.f32.gmra.mxu0 %vm493_vm0, %v492_v16  ;;  %v1478_v16 = vld [vmem:[%s1571_s10 + $0x8] sm:$0xff] }
  0x57   : > { %923 = vmatpush.msrb.mxu1 %v1478_v16 }
  0x59   : > { %924 = vmatpush.msrb.mxu1 %v1484_v17 }
  0x9b   : > { %v535_v18 = vpop.f32.mrf.mxu0 }
  0x9c   : > { %1149 = vmatmul.msk.f32.vlgmr.msra.gmra.mxu1 %vm561_vm1, %v535_v18 }
  0xa3   : > { %v538_v19 = vpop.f32.mrf.mxu0 }
  0xa4   : > { %1150 = vmatmul.msk.f32.gmra.mxu1 %vm561_vm1, %v538_v19 }
  0xab   : > { %v541_v20 = vpop.f32.mrf.mxu0 }
  0xac   : > { %1151 = vmatmul.msk.f32.gmra.mxu1 %vm561_vm1, %v541_v20 }
  0xb3   : > { %v544_v21 = vpop.f32.mrf.mxu0 }
  0xb4   : > { %1152 = vmatmul.msk.f32.gmra.mxu1 %vm561_vm1, %v544_v21 }
  0xbb   : > { %v547_v22 = vpop.f32.mrf.mxu0 }
  0xbc   : > { %1153 = vmatmul.msk.f32.gmra.mxu1 %vm561_vm1, %v547_v22 }
  0xc3   : > { %v550_v23 = vpop.f32.mrf.mxu0 }
  0xc4   : > { %1154 = vmatmul.msk.f32.gmra.mxu1 %vm561_vm1, %v550_v23 }
  0xcb   : > { %v553_v24 = vpop.f32.mrf.mxu0 }
  0xcc   : > { %1155 = vmatmul.msk.f32.gmra.mxu1 %vm561_vm1, %v553_v24 }
  0xd3   : > { %v556_v25 = vpop.f32.mrf.mxu0 }
  0xd4   : > { %1156 = vmatmul.msk.f32.gmra.mxu1 %vm561_vm1, %v556_v25 }
 0x119   : > { %v603_v26 = vpop.f32.mrf.mxu1 }
 0x11a   : > { %v628_v44 = vmul.f32 %v603_v26, %v603_v26 }
 0x121   : > { %v606_v27 = vpop.f32.mrf.mxu1 }
 0x122   : > { %v629_v43 = vmul.f32 %v606_v27, %v606_v27 }
 0x129   : > { %v609_v28 = vpop.f32.mrf.mxu1 }
 0x12a   : > { %v630_v42 = vmul.f32 %v609_v28, %v609_v28 }
 0x131   : > { %v612_v29 = vpop.f32.mrf.mxu1 }
 0x132   : > { %v631_v41 = vmul.f32 %v612_v29, %v612_v29 }
 0x139   : > { %v615_v30 = vpop.f32.mrf.mxu1 }
 0x13a   : > { %v632_v40 = vmul.f32 %v615_v30, %v615_v30 }
 0x141   : > { %v618_v31 = vpop.f32.mrf.mxu1 }
 0x142   : > { %v633_v39 = vmul.f32 %v618_v31, %v618_v31 }
 0x149   : > { %v621_v35 = vpop.f32.mrf.mxu1 }
 0x14a   : > { %v634_v38 = vmul.f32 %v621_v35, %v621_v35 }
 0x151   : > { %v624_v36 = vpop.f32.mrf.mxu1 }
 0x152   : > { %v635_v37 = vmul.f32 %v624_v36, %v624_v36 }
 0x154   : > { %647 = vmatpush.msra.mxu2 %v635_v37 }
 0x156   : > { %648 = vmatpush.msra.mxu2 %v634_v38 }
 0x158   : > { %649 = vmatpush.msra.mxu2 %v633_v39  ;;  %v994_v39 = vld [vmem:[%s1570_s9 + $0x58] sm:$0xff] }
 0x15a   : > { %650 = vmatpush.msra.mxu2 %v632_v40  ;;  %v993_v40 = vld [vmem:[%s1570_s9 + $0x50] sm:$0xff] }
 0x15c   : > { %651 = vmatpush.msra.mxu2 %v631_v41 }
 0x15e   : > { %652 = vmatpush.msra.mxu2 %v630_v42  ;;  %v992_v42 = vld [vmem:[%s1570_s9 + $0x48] sm:$0xff] }
 0x160   : > { %653 = vmatpush.msra.mxu2 %v629_v43  ;;  %v991_v43 = vld [vmem:[%s1570_s9 + $0x40] sm:$0xff] }
 0x162   : > { %654 = vmatpush.msra.mxu2 %v628_v44 }
 0x163   : > { %1157 = vmatmul.msk.f32.vlgmr.msra.gmra.mxu2 %vm493_vm0, %v1384_v45 }
 0x164   : > { %720 = vmatpush.msrb.mxu2 %v702_v53 }
 0x166   : > { %721 = vmatpush.msrb.mxu2 %v701_v54 }
 0x168   : > { %803 = vmatpush.msra.mxu2 %v1302_v0  ;;  %v763_v0 = vld [vmem:[%s1573_s12] sm:$0xff] }
 0x16a   : > { %804 = vmatpush.msra.mxu2 %v1304_v1  ;;  %v764_v1 = vld [vmem:[%s1573_s12 + $0x8] sm:$0xff] }
 0x16c   : > { %805 = vmatpush.msra.mxu2 %v1307_v2 }
 0x16e   : > { %806 = vmatpush.msra.mxu2 %v1310_v3 }
 0x170   : > { %807 = vmatpush.msra.mxu2 %v1313_v4 }
 0x172   : > { %808 = vmatpush.msra.mxu2 %v1316_v5 }
 0x174   : > { %809 = vmatpush.msra.mxu2 %v1319_v6 }
 0x176   : > { %810 = vmatpush.msra.mxu2 %v1322_v7 }
 0x1e6   : > { %v656_v56 = vpop.f32.mrf.mxu2 }
 0x1e7   : > { %v659_v57 = vsub.f32 0.0, %v656_v56  ;;  %v989_v56 = vld [vmem:[%s1570_s9 + $0x30] sm:$0xff] }
 0x1e9   : > { %v660_v58 = vmul.f32 1.442695, %v659_v57  ;;  %v988_v57 = vld [vmem:[%s1570_s9 + $0x28] sm:$0xff] }
 0x1eb   : > { %1197 = vpow2.f32 %v660_v58  ;;  %v987_v58 = vld [vmem:[%s1570_s9 + $0x20] sm:$0xff] }
 0x1f1   : > { %v1198_v60 = vpop.eup %1197 }
 0x1f2   : > { %v666_v61 = vmul.f32 %v1198_v60, %v1195_v59  ;;  %v985_v59 = vld [vmem:[%s1570_s9 + $0x10] sm:$0xff]  ;;  %v984_v60 = vld [vmem:[%s1570_s9 + $0x8] sm:$0xff] }
 0x1f4   : > { %1158 = vmatmul.msk.f32.vlgmr.msra.gmra.mxu3 %vm677_vm2, %v666_v61 }
 0x1f5   : > { %868 = vmatpush.msra.mxu3 %v835_v14 }
 0x1f7   : > { %869 = vmatpush.msra.mxu3 %v834_v15 }
 0x277   : > { %v698_v63 = vpop.f32.mrf.mxu3 }
 0x278   : > { %1159 = vmatmul.msk.f32.vlgmr.msrb.gmra.mxu2 %vm561_vm1, %v698_v63  ;;  %1160 = vmatmul.msk.f32.vlgmr.msrb.gmra.mxu3 %vm561_vm1, %v698_v63 }
 0x279   : > { %1003 = vmatpush.msrb.mxu3 %v994_v39 }
 0x27b   : > { %1004 = vmatpush.msrb.mxu3 %v993_v40 }
 0x27d   : > { %1005 = vmatpush.msrb.mxu3 %v992_v42 }
 0x27f   : > { %1006 = vmatpush.msrb.mxu3 %v991_v43 }
 0x280   : > { %1161 = vmatmul.msk.f32.vlgmr.msra.gmra.mxu2 %vm493_vm0, %v763_v0  ;;  %1169 = vmatmul.msk.f32.vlgmr.msra.gmra.mxu3 %vm561_vm1, %v1322_v7 }
 0x281   : > { %1007 = vmatpush.msrb.mxu3 %v990_v46 }
 0x283   : > { %1008 = vmatpush.msrb.mxu3 %v989_v56 }
 0x285   : > { %1009 = vmatpush.msrb.mxu3 %v988_v57 }
 0x287   : > { %1010 = vmatpush.msrb.mxu3 %v987_v58 }
 0x288   : > { %1162 = vmatmul.msk.f32.gmra.mxu2 %vm493_vm0, %v764_v1  ;;  %1170 = vmatmul.msk.f32.gmra.mxu3 %vm561_vm1, %v1319_v6  ;;  %v1196_v1 = vld [vmem:[%s1572_s11] ss:$0 sm:$0xff] }
 0x290   : > { %1163 = vmatmul.msk.f32.gmra.mxu2 %vm493_vm0, %v765_v8  ;;  %1171 = vmatmul.msk.f32.gmra.mxu3 %vm561_vm1, %v1316_v5 }
 0x298   : > { %1164 = vmatmul.msk.f32.gmra.mxu2 %vm493_vm0, %v766_v9  ;;  %1172 = vmatmul.msk.f32.gmra.mxu3 %vm561_vm1, %v1313_v4 }
 0x2a0   : > { %1165 = vmatmul.msk.f32.gmra.mxu2 %vm493_vm0, %v767_v10  ;;  %1173 = vmatmul.msk.f32.gmra.mxu3 %vm561_vm1, %v1310_v3 }
 0x2a8   : > { %1166 = vmatmul.msk.f32.gmra.mxu2 %vm493_vm0, %v768_v11  ;;  %1174 = vmatmul.msk.f32.gmra.mxu3 %vm561_vm1, %v1307_v2 }
 0x2b0   : > { %1167 = vmatmul.msk.f32.gmra.mxu2 %vm493_vm0, %v769_v12 }
 0x2b8   : > { %1168 = vmatmul.msk.f32.gmra.mxu2 %vm493_vm0, %v770_v13 }
 0x2fb   : > { %v723_v18 = vpop.f32.mrf.mxu2  ;;  %v745_v7 = vpop.f32.mrf.mxu3 }
 0x2fc   : > { %v748_v19 = vmul.f32 %v745_v7, %v723_v18 }
 0x2fe   : > { %1199 = vrsqrt.f32 %v748_v19  ;;  %vm756_vm4 = vweird.f32 %v748_v19  ;;  %vm749_vm6 = vcmp.gt.f32.partialorder %v748_v19, 0.0 }
 0x303   : > { %v812_v20 = vpop.f32.mrf.mxu2  ;;  %v871_v33 = vpop.f32.mrf.mxu3 }
 0x304   : > { %v1200_v21 = vpop.eup %1199 }
 0x305   : > { %v751_v22 = vmul.f32 %v1200_v21, %v748_v19  ;;  %vm757_vm3 = vweird.f32 %v1200_v21 }
 0x306   : > { %vm758_vm5 = vmor %vm756_vm4, %vm757_vm3 }
 0x307   : > { %v752_v23 = vmul.f32 %v1200_v21, %v751_v22 }
 0x309   : > { %v753_v24 = vmul.f32 0.5, %v752_v23 }
 0x30b   : > { %v754_v25 = vsub.f32 1.5, %v753_v24  ;;  %v814_v6 = vpop.f32.mrf.mxu2  ;;  %v874_v34 = vpop.f32.mrf.mxu3 }
 0x30d   : > { %v755_v26 = vmul.f32 %v1200_v21, %v754_v25 }
 0x30f   : > { %v759_v5 = vsel %vm758_vm5, %v1200_v21, %v755_v26 }
 0x310   : > { %v760_v27 = vsel %vm749_vm6, %v759_v5, 0.0 }
 0x311   : > { %v761_v4 = vmul.f32 %v760_v27, %v666_v61  ;;  %v983_v61 = vld [vmem:[%s1570_s9] sm:$0xff] }
 0x313   : > { %v816_v28 = vpop.f32.mrf.mxu2  ;;  %762 = vst.msk [vmem:[%s472_s28] sm:$0xff] %vm677_vm2, %v761_v4  ;;  %v877_v2 = vpop.f32.mrf.mxu3 }
 0x314   : > { %1175 = vmatmul.msk.f32.vlgmr.msrb.gmra.mxu1 %vm561_vm1, %v816_v28 }
 0x31b   : > { %v819_v29 = vpop.f32.mrf.mxu2  ;;  %v880_v38 = vpop.f32.mrf.mxu3 }
 0x31c   : > { %1176 = vmatmul.msk.f32.gmra.mxu1 %vm561_vm1, %v819_v29 }
 0x323   : > { %v822_v3 = vpop.f32.mrf.mxu2  ;;  %v883_v44 = vpop.f32.mrf.mxu3 }
 0x324   : > { %1177 = vmatmul.msk.f32.gmra.mxu1 %vm561_vm1, %v822_v3 }
 0x32b   : > { %v825_v30 = vpop.f32.mrf.mxu2  ;;  %v886_v48 = vpop.f32.mrf.mxu3 }
 0x32c   : > { %1178 = vmatmul.msk.f32.gmra.mxu1 %vm561_vm1, %v825_v30 }
 0x333   : > { %v828_v31 = vpop.f32.mrf.mxu2 }
 0x334   : > { %1179 = vmatmul.msk.f32.gmra.mxu1 %vm561_vm1, %v828_v31 }
 0x33b   : > { %v831_v32 = vpop.f32.mrf.mxu2 }
 0x33c   : > { %1180 = vmatmul.msk.f32.gmra.mxu1 %vm561_vm1, %v831_v32 }
 0x391   : > { %v926_v35 = vpop.f32.mrf.mxu1 }
 0x392   : > { %v945_v55 = vmul.f32 %v926_v35, %v871_v33 }
 0x399   : > { %v929_v36 = vpop.f32.mrf.mxu1 }
 0x39a   : > { %v946_v54 = vmul.f32 %v929_v36, %v874_v34 }
 0x3a1   : > { %v932_v37 = vpop.f32.mrf.mxu1 }
 0x3a2   : > { %v947_v53 = vmul.f32 %v932_v37, %v877_v2 }
 0x3a9   : > { %v935_v41 = vpop.f32.mrf.mxu1 }
 0x3aa   : > { %v948_v52 = vmul.f32 %v935_v41, %v880_v38 }
 0x3b1   : > { %v938_v47 = vpop.f32.mrf.mxu1 }
 0x3b2   : > { %v949_v51 = vmul.f32 %v938_v47, %v883_v44 }
 0x3b9   : > { %v941_v49 = vpop.f32.mrf.mxu1 }
 0x3ba   : > { %v950_v50 = vmul.f32 %v941_v49, %v886_v48 }
 0x3bc   : > { %965 = vmatpush.msrb.mxu0 %v950_v50 }
 0x3be   : > { %966 = vmatpush.msrb.mxu0 %v949_v51 }
 0x3c0   : > { %967 = vmatpush.msrb.mxu0 %v948_v52 }
 0x3c2   : > { %968 = vmatpush.msrb.mxu0 %v947_v53 }
 0x3c4   : > { %969 = vmatpush.msrb.mxu0 %v946_v54 }
 0x3c6   : > { %970 = vmatpush.msrb.mxu0 %v945_v55 }
 0x3c7   : > { %1181 = vmatmul.msk.f32.vlgmr.msrb.gmra.mxu0 %vm951_vm7, %v1384_v45  ;;  %v986_v45 = vld [vmem:[%s1570_s9 + $0x18] sm:$0xff] }
 0x3c8   : > { %1036 = vmatpush.msra.mxu0 %v1478_v16  ;;  %1011 = vmatpush.msrb.mxu3 %v986_v45 }
 0x3ca   : > { %1037 = vmatpush.msra.mxu0 %v1484_v17  ;;  %1012 = vmatpush.msrb.mxu3 %v985_v59 }
 0x3cc   : > { %1013 = vmatpush.msrb.mxu3 %v984_v60 }
 0x3ce   : > { %1014 = vmatpush.msrb.mxu3 %v983_v61 }
 0x444   : > { %v972_v62 = vpop.f32.mrf.mxu0 }
 0x445   : > { %v975_v63 = vsub.f32 0.0, %v972_v62 }
 0x447   : > { %v976_v0 = vmul.f32 1.442695, %v975_v63 }
 0x449   : > { %1201 = vpow2.f32 %v976_v0 }
 0x44f   : > { %v1202_v8 = vpop.eup %1201 }
 0x450   : > { %v982_v9 = vmul.f32 %v1202_v8, %v1196_v1 }
 0x452   : > { %1182 = vmatmul.msk.f32.vlgmr.msrb.gmra.mxu3 %vm995_vm8, %v982_v9 }
 0x4d5   : > { %v1016_v10 = vpop.f32.mrf.mxu3 }
 0x4d6   : > { %1183 = vmatmul.msk.f32.vlgmr.msra.gmra.mxu0 %vm561_vm1, %v1016_v10 }
 0x553   : > { %v1039_v11 = vpop.f32.mrf.mxu0 }
 0x554   : > { %1203 = vrcp.f32 %v1039_v11  ;;  %vm1042_vm9 = vcmp.gt.f32.partialorder %v1039_v11, 0.0 }
 0x55a   : > { %v1204_v12 = vpop.eup %1203 }
 0x55b   : > { %v1044_v13 = vsel %vm1042_vm9, %v1204_v12, 0.0 }
 0x55c   : > { %v1045_v14 = vmul.f32 %v1044_v13, %v982_v9 }
 0x55e   : > { %1047 = vst.msk [vmem:[%s476_s17] sm:$0x3f] %vm1046_vm10, %v1045_v14 }
 0x55f PF: > { %s25_s29 = sadd.s32 1, %s1211_s29  }
 0x560   : > { %p22_p4 = scmp.ge.s32.totalorder %s25_s29, 4  }
 0x562   :  { %24 = sbr.rel (!%p22_p4) target bundleno = 1 (0x1), region = 114 }

</bundles_post_ra>
